<compile_context>
chip_gen: v7x
topology: tpu7x:2x2x1
jax: 0.10.0
libtpu: 0.0.40
codegen_flags: <defaults>
</compile_context>

<pallas_src>
import jax
import jax.numpy as jnp
from jax.experimental import pallas as pl
from jax.experimental.pallas import tpu as pltpu


def kvcache_kernel(x_ref, pos_ref, p_ref, o_ref):
    # x_ref:   SMEM (B*IN,) int32   -- activations (torch int64; values are small)
    # pos_ref: SMEM (B,)    int32   -- input_pos per row
    # p_ref:   VMEM (IN+1, OUT) f32 -- rows 0..IN-1 = W^T, row IN = bias
    # o_ref:   VMEM (B, OUT) f32
    B = pos_ref.shape[0]
    IN = x_ref.shape[0] // B

    # Static unroll over the (tiny) batch; per row: IN scalar-broadcast VPU FMAs
    # in exact f32 — no MXU pass, no bf16.
    for b in range(B):
        y = p_ref[IN:IN + 1, :]  # bias row
        for i in range(IN):
            y = y + x_ref[b * IN + i].astype(jnp.float32) * p_ref[i:i + 1, :]
        # torch .to(torch.long) truncates toward zero; f32->s32 convert matches
        # for in-range finite values.
        yi = y.astype(jnp.int32) + pos_ref[b]
        o_ref[b:b + 1, :] = yi.astype(jnp.float32)


def prepare_linear_params(weight, bias):
    """One-time parameter prep (hoist out of the decode loop).

    weight: [OUT, IN] f32, bias: [OUT] f32
      -> packed [IN+1, OUT] f32 : rows 0..IN-1 hold W^T, last row holds bias.
    Single array == single input DMA in the kernel prologue.
    """
    return jnp.concatenate(
        [weight.T.astype(jnp.float32), bias.reshape(1, -1).astype(jnp.float32)],
        axis=0,
    )


def module_kv_cache_input_pos(x_long, input_pos, params):
    """x_long: [B, IN] int, input_pos: [B] int, params: [IN+1, OUT] f32 packed."""
    B, IN = x_long.shape
    OUT = params.shape[1]

    # TODO(synk): int64 inputs are carried as int32 (no native in-kernel int64 on
    # TPU); values in this module (x < 100, small positions) make this lossless.
    x_i32 = x_long.astype(jnp.int32).reshape(-1)        # 1D SMEM: 16 B, not 4 KiB
    pos_i32 = input_pos.astype(jnp.int32).reshape(-1)

    return pl.pallas_call(
        kvcache_kernel,
        out_shape=jax.ShapeDtypeStruct((B, OUT), jnp.float32),
        in_specs=[
            pl.BlockSpec(memory_space=pltpu.MemorySpace.SMEM),  # x (1D)
            pl.BlockSpec(memory_space=pltpu.MemorySpace.SMEM),  # input_pos (1D)
            pl.BlockSpec(memory_space=pltpu.MemorySpace.VMEM),  # packed W^T + bias
        ],
        out_specs=pl.BlockSpec(memory_space=pltpu.MemorySpace.VMEM),
        cost_estimate=pl.CostEstimate(
            flops=B * (2 * IN * OUT + 2 * OUT),
            transcendentals=0,
            bytes_accessed=(B * IN + B + params.size + B * OUT) * 4,
        ),
    )(x_i32, pos_i32, params)


if __name__ == "__main__":
    key = jax.random.PRNGKey(0)
    k_w, k_b, k_x = jax.random.split(key, 3)

    IN, OUT = 3, 3
    bound = 1.0 / (IN ** 0.5)  # torch.nn.Linear default init range
    weight = jax.random.uniform(k_w, (OUT, IN), jnp.float32, -bound, bound)
    bias = jax.random.uniform(k_b, (OUT,), jnp.float32, -bound, bound)

    # matches get_random_inputs(): x ~ randint(100, [1, 3]) long, input_pos = [0]
    x = jax.random.randint(k_x, (1, 3), 0, 100, dtype=jnp.int32)
    input_pos = jnp.array([0], dtype=jnp.int32)

    # One-time weight prep (a decode loop would reuse `params` across tokens).
    params = prepare_linear_params(weight, bias)

    out = jax.block_until_ready(module_kv_cache_input_pos(x, input_pos, params))

    # Pure-JAX reference with the SAME f32 accumulation order as the kernel
    # (bias + x0*w0 + x1*w1 + x2*w2, exact f32), so the float->int truncation
    # is bit-identical.
    xf = x.astype(jnp.float32)
    wt, b_row = params[:IN, :], params[IN:IN + 1, :]
    y_ref = b_row
    for i in range(IN):
        y_ref = y_ref + xf[:, i:i + 1] * wt[i:i + 1, :]
    ref = (
        y_ref.astype(jnp.int32) + input_pos.astype(jnp.int32).reshape(-1, 1)
    ).astype(jnp.float32)

    assert out.shape == (1, OUT) and out.dtype == jnp.float32
    assert jnp.array_equal(out, ref), (out, ref)
    print("KERNEL_OK")
</pallas_src>

<mosaic_0001>
module attributes {stable_mosaic.version = 11 : i64} {
  func.func @kvcache_kernel(%arg0: memref<3xi32, #tpu.memory_space<smem>>, %arg1: memref<1xi32, #tpu.memory_space<smem>>, %arg2: memref<4x3xf32, #tpu.memory_space<vmem>>, %arg3: memref<1x3xf32, #tpu.memory_space<vmem>>) attributes {dimension_semantics = [], scalar_prefetch = 0 : i64, scratch_operands = 0 : i64, tpu.core_type = #tpu.core_type<tc>} {
    %c3 = arith.constant 3 : index
    %c0 = arith.constant 0 : index
    %0 = vector.load %arg2[%c3, %c0] : memref<4x3xf32, #tpu.memory_space<vmem>>, vector<1x3xf32>
    %c0_0 = arith.constant 0 : index
    %1 = memref.load %arg0[%c0_0] : memref<3xi32, #tpu.memory_space<smem>>
    %2 = arith.sitofp %1 : i32 to f32
    %c0_1 = arith.constant 0 : index
    %c0_2 = arith.constant 0 : index
    %3 = vector.load %arg2[%c0_1, %c0_2] : memref<4x3xf32, #tpu.memory_space<vmem>>, vector<1x3xf32>
    %4 = vector.broadcast %2 : f32 to vector<1x3xf32>
    %5 = arith.mulf %4, %3 : vector<1x3xf32>
    %6 = arith.addf %0, %5 : vector<1x3xf32>
    %c1 = arith.constant 1 : index
    %7 = memref.load %arg0[%c1] : memref<3xi32, #tpu.memory_space<smem>>
    %8 = arith.sitofp %7 : i32 to f32
    %c1_3 = arith.constant 1 : index
    %c0_4 = arith.constant 0 : index
    %9 = vector.load %arg2[%c1_3, %c0_4] : memref<4x3xf32, #tpu.memory_space<vmem>>, vector<1x3xf32>
    %10 = vector.broadcast %8 : f32 to vector<1x3xf32>
    %11 = arith.mulf %10, %9 : vector<1x3xf32>
    %12 = arith.addf %6, %11 : vector<1x3xf32>
    %c2 = arith.constant 2 : index
    %13 = memref.load %arg0[%c2] : memref<3xi32, #tpu.memory_space<smem>>
    %14 = arith.sitofp %13 : i32 to f32
    %c2_5 = arith.constant 2 : index
    %c0_6 = arith.constant 0 : index
    %15 = vector.load %arg2[%c2_5, %c0_6] : memref<4x3xf32, #tpu.memory_space<vmem>>, vector<1x3xf32>
    %16 = vector.broadcast %14 : f32 to vector<1x3xf32>
    %17 = arith.mulf %16, %15 : vector<1x3xf32>
    %18 = arith.addf %12, %17 : vector<1x3xf32>
    %19 = arith.fptosi %18 : vector<1x3xf32> to vector<1x3xi32>
    %c0_7 = arith.constant 0 : index
    %20 = memref.load %arg1[%c0_7] : memref<1xi32, #tpu.memory_space<smem>>
    %21 = vector.broadcast %20 : i32 to vector<1x3xi32>
    %22 = arith.addi %19, %21 : vector<1x3xi32>
    %23 = arith.sitofp %22 : vector<1x3xi32> to vector<1x3xf32>
    %c0_8 = arith.constant 0 : index
    %c0_9 = arith.constant 0 : index
    %24 = vector.load %arg3[%c0_8, %c0_9] : memref<1x3xf32, #tpu.memory_space<vmem>>, vector<1x3xf32>
    tpu.vector_store %arg3[%c0_8, %c0_9], %23 {strides = array<i32>} : memref<1x3xf32, #tpu.memory_space<vmem>>, vector<1x3xf32>,
    return
  }
}

</mosaic_0001>

<bundles_post_ra>
// kernel: tpu_custom_call.1
= control target key start
LH: loop header
LB: loop body
LE: loop exit
PB: predicated region body
PF: predicated region fallthrough
CT: control target
= control target key end

     0   :  { %9 = vsyncpa [#allocation5], 0  ;;  %s166_s0 = inlined_call_operand.vmem [shape: s32[3], index: 0, kind: input, shape index: {}]   ;;  %s167_s1 = inlined_call_operand.<no memory space> [shape: s32[1], index: 1, kind: input, shape index: {}]   ;;  %s168_s2 = inlined_call_operand.vmem [shape: f32[4,3], index: 2, kind: input, shape index: {}]   ;;  %s169_s3 = inlined_call_operand.hbm [shape: f32[1,3], index: 3, kind: output, shape index: {}]  }
   0x1   :  { %10 = vsyncpa [#allocation4], 0  ;;  %s17_s14 = sshll.u32 %s166_s0, 4  ;;  %s18_s14 = int_to_ptr.vmem [resolvable:$true] %s17_s14 }
   0x2   :  { %s76_s15 = scalar_lea.vmem %s18_s14, 16  ;;  %p81_p1 = scmp.lt.s32.totalorder %s18_s14, %s18_s14 }
   0x3   :  { %p77_p0 = scmp.ne.s32.totalorder %s18_s14, %s76_s15  ;;  %p82_p2 = scmp.lt.s32.totalorder %s76_s15, %s76_s15 }
   0x5   :  { %p83_p3 = por %p82_p2, %p81_p1 }
   0x7   :  { %p84_p4 = pnand %p83_p3, %p77_p0 }
   0x9   :  { %87 = shalt.err (!%p84_p4)
}
   0xa   :  { %s114_s16 = smov [#allocation3]  }
   0xb   :  { %20 = dma.vmem_to_smem %s18_s14, 16, %s114_s16, [#allocation5]  }
   0xc   :  { %110 = dma.done.wait [#allocation5], 16  }
   0xd   :  { %111 = vsyncadd [#allocation5], 4294967280 }
   0xe   :  { %28 = sfence }
   0xf   :  { %s30_s17 = sld [smem:[#allocation3]]  ;;  %s70_s18 = sld [smem:[#allocation3 + $0x1]]  ;;  %v32_v0 = vld [vmem:[%s168_s2] sm:$0x1]  ;;  %v38_v1 = vld [vmem:[%s168_s2 + $0x1] sm:$0x1]  ;;  %v50_v14 = vstv %s167_s1 }
  0x10   :  { %s71_s19 = sld [smem:[#allocation3 + $0x2]]  ;;  %v29_v2 = vld [vmem:[%s168_s2 + $0x3] sm:$0x1]  ;;  %v44_v4 = vld [vmem:[%s168_s2 + $0x2] sm:$0x1]  ;;  %s115_s5 = smov [#allocation6]  }
  0x11   :  { %s61_s6 = sshll.u32 %s115_s5, 4  ;;  %vm53_vm0 = vcmask 16384   ;;  %s62_s6 = int_to_ptr.vmem [resolvable:$true] %s61_s6 }
  0x12   :  { %s88_s2 = scalar_lea.vmem %s62_s6, 16  ;;  %s92_s7 = scalar_lea.vmem %s62_s6, 32 }
  0x13   :  { %p89_p5 = scmp.ne.s32.totalorder %s62_s6, %s88_s2  ;;  %p93_p6 = scmp.lt.s32.totalorder %s62_s6, %s62_s6 }
  0x14   :  { %p94_p7 = scmp.lt.s32.totalorder %s92_s7, %s88_s2 }
  0x15   :  { %s31_s20 = scvt.s32.f32 %s30_s17  ;;  %s37_s0 = scvt.s32.f32 %s70_s18 }
  0x16   :  { %s43_s25 = scvt.s32.f32 %s71_s19  ;;  %p95_p8 = por %p94_p7, %p93_p6 }
  0x17   :  { %v33_v3 = vstv %s31_s20  ;;  %v39_v6 = vstv %s37_s0 }
  0x18   :  { %v34_v5 = vmul.f32 %v33_v3, %v32_v0  ;;  %v45_v7 = vstv %s43_s25  ;;  %v40_v8 = vmul.f32 %v39_v6, %v38_v1  ;;  %p96_p9 = pnand %p95_p8, %p89_p5 }
  0x19   :  { %v46_v10 = vmul.f32 %v45_v7, %v44_v4 }
  0x1a   :  { %v35_v9 = vadd.f32 %v34_v5, %v29_v2 }
  0x1c   :  { %v41_v11 = vadd.f32 %v40_v8, %v35_v9 }
  0x1e   :  { %v47_v12 = vadd.f32 %v46_v10, %v41_v11 }
  0x20   :  { %v72_v13 = vtrunc.f32 %v47_v12 }
  0x22   :  { %v73_v15 = vcvt.f32.s32 %v72_v13 }
  0x24   :  { %v51_v16 = vadd.s32 %v73_v15, %v50_v14 }
  0x26   :  { %v52_v17 = vcvt.s32.f32 %v51_v16 }
  0x28   :  { %54 = vst.msk [vmem:[#allocation6] sm:$0x1] %vm53_vm0, %v52_v17 }
  0x29   :  { %99 = shalt.err (!%p96_p9)
}
  0x2a   :  { %s100_s1 = scalar_lea.hbm %s169_s3, 16 }
  0x2b   :  { %p101_p10 = scmp.ne.s32.totalorder %s169_s3, %s100_s1  ;;  %p104_p11 = scmp.lt.u32.totalorder %s100_s1, %s169_s3 }
  0x2d   :  { %p106_p12 = pnand %p104_p11, %p101_p10 }
  0x2f   :  { %109 = shalt.err (!%p106_p12)
}
  0x30   :  { %64 = dma.vmem_to_hbm [thread:$0]  %s62_s6, 16, %s169_s3, [#allocation4]  }
  0x31   :  { %112 = dma.done.wait [#allocation4], 16  }
  0x32   :  { %113 = vsyncadd [#allocation4], 4294967280 }
  0x33   :  { %68 = vsyncpa [#allocation4], 1 }
  0x34   :  { %69 = vsyncpa [#allocation5], 1 }

</bundles_post_ra>
